<compile_context>
chip_gen: v7x
topology: tpu7x:2x2x1
jax: 0.10.0
libtpu: 0.0.40
codegen_flags: <defaults>
</compile_context>

<pallas_src>
import jax
import jax.numpy as jnp
from jax.experimental import pallas as pl
from jax.experimental.pallas import tpu as pltpu

LANE = 128
_TARGET_BLOCK_BYTES = 2 << 20   # ~2 MiB per pe tile => 1-3 us of DMA per grid step


def _aggregate_kernel(h_ref, pe_ref, o_ref):
    # h_ref:  (S, S)   hat matrix, VMEM-resident across all grid steps
    # pe_ref: (S, TN)  lane tile of flattened point estimates (N = B*D)
    # o_ref:  (S, TN)  fitted trajectory tile
    o_ref[...] = jnp.dot(
        h_ref[...], pe_ref[...], preferred_element_type=jnp.float32
    ).astype(o_ref.dtype)


def _hat_matrix(S):
    # Center t so A = [t - (S-1)/2, 1] has a diagonal Gram matrix:
    #   H = A (A^T A)^-1 A^T = outer(tc, tc)/sum(tc^2) + 1/S
    t = jnp.arange(S, dtype=jnp.float32)
    tc = t - (S - 1) / 2.0
    sum_t2 = jnp.sum(tc * tc)
    return jnp.outer(tc, tc) / sum_t2 + (1.0 / S)


def constant_speed_random_walk_aggregate(point_estimate, displacements=None, *,
                                          block_lanes=None):
    del displacements  # unused by the reference forward
    S, B, D = point_estimate.shape
    dtype = point_estimate.dtype
    N = B * D

    if S == 1:
        # Degenerate fit (singular design): fitted trajectory == input.
        return point_estimate

    H = _hat_matrix(S).astype(dtype)                     # (S, S), native dtype
    pe_flat = point_estimate.reshape(S, N)               # bitcast, no HBM pass
    itemsize = jnp.dtype(dtype).itemsize

    # ---- lane-tile size selection (~2 MiB blocks, multiple of 128 lanes) ----
    Npad = LANE * pl.cdiv(N, LANE)
    if block_lanes is None:
        tn_target = max(512, LANE * (_TARGET_BLOCK_BYTES // (itemsize * S) // LANE))
    else:
        tn_target = LANE * pl.cdiv(int(block_lanes), LANE)

    # Small-N fast path: single tile => pallas_call launch overhead dominates.
    if Npad <= tn_target:
        out_flat = jnp.dot(H, pe_flat,
                           preferred_element_type=jnp.float32).astype(dtype)
        return out_flat.reshape(S, B, D)

    # ---- Pallas path: >=2 balanced tiles (v7x megacore sharding), ragged last
    #      block is masked by Pallas at a 128-aligned boundary ----
    if Npad != N:
        # Only needed when B*D is not a multiple of 128 (keeps stores lane-dense).
        pe_flat = jnp.pad(pe_flat, ((0, 0), (0, Npad - N)))

    num_tiles = pl.cdiv(Npad, tn_target)
    TN = LANE * pl.cdiv(pl.cdiv(Npad, num_tiles), LANE)   # balanced, mult. of 128
    grid = (pl.cdiv(Npad, TN),)

    # VMEM budget: H + double-buffered pe/out tiles + margin; generation-aware cap.
    try:
        vmem_capacity = pltpu.get_tpu_info().vmem_capacity_bytes
    except Exception:  # pragma: no cover - conservative fallback
        vmem_capacity = 128 << 20
    need = itemsize * S * S + 2 * 2 * itemsize * S * TN + (4 << 20)
    vmem_cap = max(24 << 20, min(int(vmem_capacity * 2) // 5, 64 << 20))
    vmem_limit = int(min(max(need, 16 << 20), vmem_cap))

    out_flat = pl.pallas_call(
        _aggregate_kernel,
        out_shape=jax.ShapeDtypeStruct((S, Npad), dtype),
        grid_spec=pltpu.PrefetchScalarGridSpec(
            num_scalar_prefetch=0,
            grid=grid,
            in_specs=[
                pl.BlockSpec((S, S), lambda j: (0, 0)),    # H: VMEM-resident
                pl.BlockSpec((S, TN), lambda j: (0, j)),   # pe: streamed
            ],
            out_specs=pl.BlockSpec((S, TN), lambda j: (0, j)),
        ),
        compiler_params=pltpu.CompilerParams(
            dimension_semantics=("parallel",),   # shard lane tiles across TCs
            vmem_limit_bytes=vmem_limit,
        ),
        cost_estimate=pl.CostEstimate(
            flops=2 * S * S * Npad,
            bytes_accessed=itemsize * (2 * S * Npad + S * S),
            transcendentals=0,
        ),
    )(H, pe_flat)

    if Npad != N:
        out_flat = out_flat[:, :N]
    return out_flat.reshape(S, B, D)


def _reference(point_estimate):
    # Independent plain-JAX reference: least-squares smoothing with uncentered [t, 1].
    S = point_estimate.shape[0]
    t = jnp.arange(S, dtype=jnp.float32)
    A = jnp.stack([t, jnp.ones_like(t)], axis=-1)
    H = A @ jnp.linalg.inv(A.T @ A) @ A.T
    return jnp.einsum("st,tbd->sbd", H, point_estimate.astype(jnp.float32))


if __name__ == "__main__":
    key = jax.random.PRNGKey(0)
    k1, k2, k3 = jax.random.split(key, 3)

    # Toy shape matching the module (small-N fast path).
    S, B, D = 16, 8, 2
    point_estimate = jax.random.normal(k1, (S, B, D), dtype=jnp.float32)
    displacements = jax.random.normal(k2, (S - 1, B, D), dtype=jnp.float32)

    out = constant_speed_random_walk_aggregate(point_estimate, displacements)
    out = jax.block_until_ready(out)
    assert out.shape == (S, B, D) and out.dtype == point_estimate.dtype
    ref = _reference(point_estimate)
    assert jnp.allclose(out, ref, rtol=1e-3, atol=1e-3), "mismatch vs reference (toy)"

    # Native-dtype (bf16) fast path: dtype preserved, halved HBM traffic.
    out_bf16 = constant_speed_random_walk_aggregate(point_estimate.astype(jnp.bfloat16))
    out_bf16 = jax.block_until_ready(out_bf16)
    assert out_bf16.dtype == jnp.bfloat16
    assert jnp.allclose(out_bf16.astype(jnp.float32), ref, rtol=5e-2, atol=1e-1), \
        "mismatch vs reference (bf16)"

    # Pallas path at small shapes: force block_lanes=256 -> N=640 lanes, grid=(3,),
    # last tile ragged (128 of 256 lanes valid, at a 128-aligned boundary).
    B2 = 320
    point_estimate2 = jax.random.normal(k3, (S, B2, D), dtype=jnp.float32)
    out2 = constant_speed_random_walk_aggregate(point_estimate2, block_lanes=256)
    out2 = jax.block_until_ready(out2)
    assert out2.shape == (S, B2, D)
    ref2 = _reference(point_estimate2)
    assert jnp.allclose(out2, ref2, rtol=1e-3, atol=1e-3), \
        "mismatch vs reference (tiled / ragged last block)"

    print("KERNEL_OK")
</pallas_src>

<mosaic_0001>
module attributes {stable_mosaic.version = 11 : i64} {
  func.func @_aggregate_kernel(%arg0: i32, %arg1: memref<16x16xf32, #tpu.memory_space<vmem>>, %arg2: memref<16x256xf32, #tpu.memory_space<vmem>>, %arg3: memref<16x256xf32, #tpu.memory_space<vmem>>) attributes {dimension_semantics = [#tpu.dimension_semantics<parallel>], iteration_bounds = array<i64: 3>, scalar_prefetch = 0 : i64, scratch_operands = 0 : i64, tpu.core_type = #tpu.core_type<tc>, window_params = [{pipeline_mode = #tpu.pipeline_mode<synchronous>, transform_indices = @transform_0, window_bounds = array<i64: 16, 16>}, {transform_indices = @transform_1, window_bounds = array<i64: 16, 256>}, {transform_indices = @transform_2, window_bounds = array<i64: 16, 256>}]} {
    %c0 = arith.constant 0 : index
    %c0_0 = arith.constant 0 : index
    %0 = vector.load %arg1[%c0, %c0_0] : memref<16x16xf32, #tpu.memory_space<vmem>>, vector<16x16xf32>
    %c0_1 = arith.constant 0 : index
    %c0_2 = arith.constant 0 : index
    %1 = vector.load %arg2[%c0_1, %c0_2] : memref<16x256xf32, #tpu.memory_space<vmem>>, vector<16x256xf32>
    %cst = arith.constant dense<0.000000e+00> : vector<16x256xf32>
    %2 = tpu.matmul %0, %1, %cst {dimension_numbers = #tpu.dot_dimension_numbers<[1], [0], [0], [1], [0, 0, 1, 1], [], []>} : vector<16x16xf32>, vector<16x256xf32>, vector<16x256xf32> -> vector<16x256xf32>
    %c0_3 = arith.constant 0 : index
    %c0_4 = arith.constant 0 : index
    %3 = vector.load %arg3[%c0_3, %c0_4] : memref<16x256xf32, #tpu.memory_space<vmem>>, vector<16x256xf32>
    tpu.vector_store %arg3[%c0_3, %c0_4], %2 {strides = array<i32>} : memref<16x256xf32, #tpu.memory_space<vmem>>, vector<16x256xf32>,
    return
  }
  func.func @transform_0(%arg0: i32) -> (i32, i32) {
    %c0_i32 = arith.constant 0 : i32
    %c0_i32_0 = arith.constant 0 : i32
    %c0_i32_1 = arith.constant 0 : i32
    return %c0_i32, %c0_i32_0 : i32, i32
  }
  func.func @transform_1(%arg0: i32) -> (i32, i32) {
    %c0_i32 = arith.constant 0 : i32
    %c0_i32_0 = arith.constant 0 : i32
    return %c0_i32, %arg0 : i32, i32
  }
  func.func @transform_2(%arg0: i32) -> (i32, i32) {
    %c0_i32 = arith.constant 0 : i32
    %c0_i32_0 = arith.constant 0 : i32
    return %c0_i32, %arg0 : i32, i32
  }
}

</mosaic_0001>

<bundles_post_ra>
// kernel: tpu_custom_call.1
= control target key start
LH: loop header
LB: loop body
LE: loop exit
PB: predicated region body
PF: predicated region fallthrough
CT: control target
= control target key end

     0   :  { %7 = vsyncpa [#allocation3], 0  ;;  %s865_s0 = inlined_call_operand.hbm [shape: f32[16,16], index: 0, kind: input, shape index: {}]   ;;  %s866_s1 = inlined_call_operand.hbm [shape: f32[16,640], index: 1, kind: input, shape index: {}]   ;;  %s867_s2 = inlined_call_operand.hbm [shape: f32[16,640], index: 2, kind: output, shape index: {}]  }
   0x1   :  { %8 = vsyncpa [#allocation6], 0 }
   0x2   :  { %10 = vsyncpa [#allocation6 + $0x1], 0 }
   0x3   :  { %11 = vsyncpa [#allocation4], 0 }
   0x4   :  { %13 = vsyncpa [#allocation4 + $0x1], 0  ;;  %s644_s9 = smov 0   ;;  %s646_s10 = smov 0  }
   0x5   :  { %s648_s11 = smov 0   ;;  %s650_s12 = smov 0  }
   0x6 LB: > { %s665_s13 = sadd.s32 4294967295, %s617_s12   ;;  %s394_s14 = sadd.s32 4294967294, %s617_s12   ;;  %s617_s12 = sphi %s650_s12, %s887_s12   ;;  %s613_s11 = sphi %s648_s11, %s886_s11   ;;  %s609_s10 = sphi %s646_s10, %s885_s10   ;;  %s605_s9 = sphi %s644_s9, %s884_s9  }
   0x7   : > { %s669_s15 = sadd.s32 1, %s617_s12   ;;  %s47_s16 = sadd.s32 1, %s613_s11 }
   0x8   : > { %s44_s17 = ssub.s32 %s617_s12, %s669_s15  ;;  %p54_p0 = scmp.ne.s32.totalorder %s613_s11, %s609_s10 }
   0x9   : > { %p45_p1 = scmp.eq.s32.totalorder %s44_s17, 0  ;;  %p55_p2 = scmp.eq.s32.totalorder %s617_s12, 0 }
   0xa   : > { %p60_p3 = scmp.ne.s32.totalorder %s609_s10, %s605_s9  ;;  %p868_p4 = scmp.eq.s32.totalorder %s665_s13, 0 }
   0xb   : > { %s681_s18 = scalar_select %p45_p1, %s613_s11, %s47_s16  }
   0xc   : > { %p683_p5 = por %p55_p2, %p54_p0  ;;  %p689_p6 = por %p868_p4, %p60_p3 }
   0xd   : > { %p84_p7 = scmp.eq.s32.totalorder %s665_s13, 2  ;;  %p90_p8 = scmp.eq.s32.totalorder %s394_s14, 2 }
   0xe   : > { %s871_s19 = scalar_select %p683_p5, 1, 0 }
   0xf   : > { %s872_s20 = scalar_select %p689_p6, 1, 0 }
  0x10   : > { %p395_p9 = scmp.ge.s32.totalorder %s617_s12, 1  ;;  %p97_p10 = scmp.lt.s32.totalorder %s617_s12, 4 }
  0x11   : > { %p696_p11 = por %p84_p7, %p54_p0  ;;  %p700_p12 = por %p90_p8, %p60_p3 }
  0x12   : > { %p704_p13 = pnand %p395_p9, %p97_p10  ;;  %s619_s24 = smov [#allocation2]  }
  0x13   : > { %s873_s21 = scalar_select %p696_p11, 1, 0 }
  0x14   : > { %s874_s22 = scalar_select %p700_p12, 1, 0 }
  0x15   : > { %s875_s23 = scalar_select %p704_p13, 1, 0 }
  0x16   : > { %p440_p1 = pneg %p704_p13  ;;  %s109_s25 = sshll.u32 %s619_s24, 4  ;;  %s110_s25 = int_to_ptr.vmem [resolvable:$true] %s109_s25 }
  0x17   : > { %s491_s29 = scalar_lea.hbm %s865_s0, 256 }
  0x18   : > { %p712_p2 = pnand %p440_p1, %p868_p4  ;;  %p492_p0 = scmp.ne.s32.totalorder %s865_s0, %s491_s29 }
  0x19   : > { %p498_p9 = scmp.lt.u32.totalorder %s491_s29, %s865_s0 }
  0x1a   : > { %p493_p3 = pneg %p712_p2 }
  0x1c   : > { %p494_p7 = pnand %p493_p3, %p492_p0 }
  0x1e   : > { %p495_p8 = pneg %p494_p7 }
  0x20   : > { %p500_p10 = pnand %p498_p9, %p495_p8 }
  0x22   : > { %503 = shalt.err (!%p500_p10)
}
  0x23   : > { %s504_s6 = scalar_lea.vmem %s110_s25, 256  ;;  %p512_p11 = scmp.lt.s32.totalorder %s110_s25, %s110_s25 }
  0x24   : > { %p505_p1 = scmp.ne.s32.totalorder %s110_s25, %s504_s6  ;;  %p513_p6 = scmp.lt.s32.totalorder %s504_s6, %s504_s6 }
  0x26   : > { %p507_p4 = pnand %p505_p1, %p493_p3  ;;  %p514_p13 = por %p513_p6, %p512_p11 }
  0x28   : > { %p508_p12 = pneg %p507_p4 }
  0x2a   : > { %p515_p5 = pnand %p514_p13, %p508_p12 }
  0x2c   : > { %518 = shalt.err (!%p515_p5)
}
  0x2d   : > { %s620_s7 = smov 128   ;;  %s621_s8 = smov 8  }
  0x2e   : > { %443 = dma.hbm_to_vmem [thread:$0]  (!%p712_p2), %s865_s0, 256, %s110_s25, [#allocation3], %s620_s7, %s620_s7, %s621_s8  }
  0x2f   : > { %p397_p0 = scmp.ge.s32.totalorder %s617_s12, 3 }
  0x30   : > { %p877_p7 = scmp.ne.s32.totalorder (!%p397_p0), %s871_s19, 0 }
  0x31   : > { %119 = sbr.rel (%p397_p0) target bundleno = 91 (0x5b), region = 20 }
  0x38   : > { %122 = sbr.rel (!%p877_p7) target bundleno = 91 (0x5b), region = 24  ;;  %s123_s17 = sand.u32 (%p877_p7), 1, %s613_s11  }
  0x39   : > { %s399_s24 = sshll.u32 (%p877_p7), %s617_s12, 1  ;;  %s398_s27 = sshll.u32 (%p877_p7), %s123_s17, 5 }
  0x3a   : > { %s129_s28 = ssub.s32 (%p877_p7), 5, %s399_s24  ;;  %s743_s29 = scalar_lea.sflag (%p877_p7), [#allocation6], %s123_s17 }
  0x3b   : > { %p130_p4 = scmp.lt.s32.totalorder (%p877_p7), %s129_s28, 2  ;;  %s127_s30 = scalar_lea.vmem (%p877_p7), [#allocation5], %s398_s27 }
  0x3f   : > { %s889_s28 = smov (!%p130_p4, %s129_s28), 2 }
  0x40   : > { %s740_s26 = sshll.u32 %s889_s28, 8 }
  0x41   : > { %s134_s25 = ssub.s32 512, %s740_s26 }
  0x42   : > { %135 = vsyncadd %s743_s29, %s134_s25  ;;  %p401_p5 = scmp.ne.s32.totalorder %s740_s26, 0  ;;  %s422_s19 = sshll.u32 %s617_s12, 8 }
  0x43   : > { %s751_s5 = scalar_lea.hbm %s866_s1, %s422_s19  ;;  %s403_s6 = sshll.u32 %s889_s28, 3 }
  0x44   : > { %s141_s7 = sshll.u32 %s127_s30, 4  ;;  %s519_s8 = scalar_lea.hbm %s751_s5, %s740_s26  ;;  %s754_s7 = int_to_ptr.vmem [resolvable:$true] %s141_s7 }
  0x45   : > { %p520_p6 = scmp.ne.s32.totalorder %s751_s5, %s519_s8  ;;  %s523_s17 = scalar_lea.hbm %s866_s1, 1280 }
  0x46   : > { %p524_p13 = scmp.lt.u32.totalorder %s751_s5, %s866_s1  ;;  %p525_p2 = scmp.lt.u32.totalorder %s523_s17, %s519_s8 }
  0x47   : > { %p521_p11 = pnand %p520_p6, %p401_p5  ;;  %p527_p8 = scmp.lt.u32.totalorder %s519_s8, %s751_s5 }
  0x48   : > { %p526_p3 = por %p525_p2, %p524_p13 }
  0x49   : > { %p522_p12 = pneg %p521_p11 }
  0x4a   : > { %p528_p9 = por %p527_p8, %p526_p3 }
  0x4c   : > { %p529_p10 = pnand %p528_p9, %p522_p12 }
  0x4e   : > { %532 = shalt.err (!%p529_p10)
}
  0x4f   : > { %s533_s25 = scalar_lea.vmem %s754_s7, %s740_s26  ;;  %s622_s30 = smov [#allocation5]  }
  0x50   : > { %p534_p1 = scmp.ne.s32.totalorder %s754_s7, %s533_s25  ;;  %s537_s19 = sshll.u32 %s622_s30, 4  ;;  %s538_s19 = int_to_ptr.vmem [resolvable:$false] %s537_s19 }
  0x51   : > { %s539_s3 = scalar_lea.vmem %s538_s19, 1024  ;;  %p540_p4 = scmp.lt.s32.totalorder %s754_s7, %s538_s19 }
  0x52   : > { %p535_p0 = pnand %p534_p1, %p401_p5  ;;  %p541_p6 = scmp.lt.s32.totalorder %s539_s3, %s533_s25 }
  0x54   : > { %p536_p7 = pneg %p535_p0  ;;  %p542_p11 = por %p541_p6, %p540_p4 }
  0x56   : > { %p543_p13 = pnand %p542_p11, %p536_p7 }
  0x58   : > { %546 = shalt.err (!%p543_p13)
}
  0x59   : > { %s623_s4 = smov 640   ;;  %s624_s8 = smov 256  }
  0x5a   : > { %147 = dma.hbm_to_vmem [thread:$0]  (%p401_p5), %s751_s5, %s740_s26, %s754_s7, %s743_s29, %s623_s4, %s624_s8, %s403_s6  }
  0x5b PF: > { %p878_p12 = scmp.ne.s32.totalorder %s875_s23, 0 }
  0x5c   : > { %p879_p2 = scmp.eq.s32.totalorder (!%p878_p12), %s665_s13, 0 }
  0x5d   : > { %153 = sbr.rel (%p878_p12) target bundleno = 355 (0x163), region = 28 }
  0x64   : > { %592 = dma.done.wait (%p879_p2), [#allocation3], 256   ;;  %p880_p3 = pmov %p879_p2 }
  0x65   : > { %s790_s14 = sand.u32 1, %s609_s10   ;;  %p881_p5 = scmp.ne.s32.totalorder %s872_s20, 0 }
  0x66   : > { %594 = vsyncadd (%p880_p3), [#allocation3], 4294967040  ;;  %s408_s16 = sshll.u32 %s790_s14, 5  ;;  %s160_s28 = scalar_lea.sflag [#allocation6], %s790_s14 }
  0x67   : > { %s163_s26 = scalar_lea.vmem [#allocation5], %s408_s16 }
  0x68   : > { %596 = dma.done.wait (%p881_p5), %s160_s28, 512  }
  0x69   : > { %598 = vsyncadd (%p881_p5), %s160_s28, 4294966784  ;;  %v625_v0 = vmov 0.0   ;;  %v197_v1 = vld [vmem:[%s163_s26 + $0x8] sm:$0xff]  ;;  %v199_v2 = vld [vmem:[%s163_s26 + $0x18] sm:$0xff]  ;;  %vm200_vm0 = vcmask 130048   ;;  %s183_s20 = scalar_lea.vmem [#allocation7], %s408_s16 }
  0x6a   : > { %271 = vmatprep.mubr.f32.mxu0 %v625_v0  ;;  %277 = vmatprep.mubr.f32.mxu1 %v625_v0  ;;  %v196_v3 = vld [vmem:[%s163_s26] sm:$0xff]  ;;  %v428_v4 = vpack.c.bf16 %v199_v2, %v197_v1  ;;  %v198_v5 = vld [vmem:[%s163_s26 + $0x10] sm:$0xff]  ;;  %v195_v8 = vld [vmem:[#allocation2 + $0x8] sm:$0xff]  ;;  %s289_s23 = scalar_lea.sflag [#allocation4], %s790_s14  ;;  %p882_p8 = scmp.ne.s32.totalorder %s873_s21, 0 }
  0x6b   : > { %v430_v6 = vpack.c.bf16 %v198_v5, %v196_v3  ;;  %v194_v7 = vld [vmem:[#allocation2] sm:$0xff]  ;;  %s413_s29 = sshll.u32 (%p882_p8), %s665_s13, 1 }
  0x6c   : > { %429 = vmatprep.subr.bf16.mxu0 %v428_v4  ;;  %432 = vmatprep.subr.bf16.mxu1 %v428_v4  ;;  %s297_s5 = ssub.s32 (%p882_p8), 5, %s413_s29 }
  0x6d   : > { %431 = vmatpush1.bf16.msra.mxu0 %v430_v6  ;;  %433 = vmatpush1.bf16.msra.mxu1 %v430_v6  ;;  %p298_p9 = scmp.lt.s32.totalorder (%p882_p8), %s297_s5, 2 }
  0x70   : > { %410 = vmatmul.mubr.msk.f32.vlgmr.msra.gmra.mrb[0].mxu0 %vm200_vm0, %v194_v7  ;;  %411 = vmatmul.mubr.msk.f32.vlgmr.msra.gmra.mrb[0].mxu1 %vm200_vm0, %v195_v8 }
 0x13f   : > { %295 = sbr.rel (!%p882_p8) target bundleno = 355 (0x163), region = 40 }
 0x143   : > { %v273_v9 = vpop.f32.mrb[0].mxu0  ;;  %v279_v10 = vpop.f32.mrb[0].mxu1 }
 0x144   : > { %284 = vst [vmem:[%s183_s20] sm:$0xff] %v273_v9  ;;  %286 = vst [vmem:[%s183_s20 + $0x10] sm:$0xff] %v279_v10  ;;  %v275_v11 = vpop.f32.mrb[1].mxu0  ;;  %v281_v12 = vpop.f32.mrb[1].mxu1 }
 0x145   : > { %285 = vst [vmem:[%s183_s20 + $0x8] sm:$0xff] %v275_v11  ;;  %287 = vst [vmem:[%s183_s20 + $0x18] sm:$0xff] %v281_v12 }
 0x146   : > { %s891_s5 = smov (!%p298_p9, %s297_s5), 2 }
 0x147   : > { %s805_s6 = sshll.u32 %s891_s5, 8 }
 0x148   : > { %s302_s7 = ssub.s32 512, %s805_s6 }
 0x149   : > { %303 = vsyncadd %s289_s23, %s302_s7  ;;  %p415_p10 = scmp.ne.s32.totalorder %s805_s6, 0  ;;  %s425_s21 = sshll.u32 %s665_s13, 8 }
 0x14a   : > { %s815_s27 = scalar_lea.hbm %s867_s2, %s425_s21  ;;  %s417_s25 = sshll.u32 %s891_s5, 3 }
 0x14b   : > { %s309_s30 = sshll.u32 %s183_s20, 4  ;;  %s626_s3 = smov [#allocation7]   ;;  %s818_s30 = int_to_ptr.vmem [resolvable:$true] %s309_s30 }
 0x14c   : > { %s547_s19 = scalar_lea.vmem %s818_s30, %s805_s6  ;;  %s551_s4 = sshll.u32 %s626_s3, 4  ;;  %s552_s4 = int_to_ptr.vmem [resolvable:$false] %s551_s4 }
 0x14d   : > { %p548_p1 = scmp.ne.s32.totalorder %s818_s30, %s547_s19  ;;  %s553_s13 = scalar_lea.vmem %s552_s4, 1024 }
 0x14e   : > { %p554_p4 = scmp.lt.s32.totalorder %s818_s30, %s552_s4  ;;  %p555_p6 = scmp.lt.s32.totalorder %s553_s13, %s547_s19 }
 0x14f   : > { %p549_p0 = pnand %p548_p1, %p415_p10 }
 0x150   : > { %p556_p11 = por %p555_p6, %p554_p4 }
 0x151   : > { %p550_p7 = pneg %p549_p0 }
 0x153   : > { %p557_p13 = pnand %p556_p11, %p550_p7 }
 0x155   : > { %560 = shalt.err (!%p557_p13)
}
 0x156   : > { %s561_s8 = scalar_lea.hbm %s815_s27, %s805_s6  ;;  %s565_s26 = scalar_lea.hbm %s867_s2, 1280 }
 0x157   : > { %p562_p12 = scmp.ne.s32.totalorder %s815_s27, %s561_s8  ;;  %p566_p5 = scmp.lt.u32.totalorder %s815_s27, %s867_s2 }
 0x158   : > { %p567_p8 = scmp.lt.u32.totalorder %s565_s26, %s561_s8  ;;  %p569_p1 = scmp.lt.u32.totalorder %s561_s8, %s815_s27 }
 0x159   : > { %p563_p2 = pnand %p562_p12, %p415_p10 }
 0x15a   : > { %p568_p9 = por %p567_p8, %p566_p5 }
 0x15b   : > { %p564_p3 = pneg %p563_p2 }
 0x15c   : > { %p570_p0 = por %p569_p1, %p568_p9 }
 0x15e   : > { %p571_p7 = pnand %p570_p0, %p564_p3 }
 0x160   : > { %574 = shalt.err (!%p571_p7)
}
 0x161   : > { %s627_s7 = smov 256   ;;  %s628_s21 = smov 640  }
 0x162   : > { %315 = dma.vmem_to_hbm [thread:$0]  (%p415_p10), %s818_s30, %s805_s6, %s815_s27, %s289_s23, %s627_s7, %s628_s21, %s417_s25  }
 0x163 PF: > { %p450_p4 = scmp.ge.s32.totalorder %s617_s12, 2  ;;  %s324_s17 = sand.u32 1, %s605_s9  }
 0x164   : > { %p883_p6 = scmp.ne.s32.totalorder %s874_s22, 0  ;;  %s325_s24 = scalar_lea.sflag [#allocation4], %s324_s17 }
 0x166   : > { %p445_p11 = pnand %p450_p4, %p883_p6 }
 0x168   : > { %600 = dma.done.wait (!%p445_p11), %s325_s24, 512  }
 0x169   : > { %602 = vsyncadd (!%p445_p11), %s325_s24, 4294966784  ;;  %p16_p13 = scmp.ge.s32.totalorder %s669_s15, 5   ;;  %s884_s9 = smov %s609_s10 }
 0x16a   : > { %s885_s10 = smov %s613_s11  ;;  %s886_s11 = smov %s681_s18 }
 0x16b   : > { %s887_s12 = smov %s669_s15  ;;  %18 = sbr.rel (!%p16_p13) target bundleno = 6 (0x6), region = 78 }
 0x172   :  { %330 = vsyncpa [#allocation3], 1 }
 0x173   :  { %332 = vsyncpa [#allocation3 + $0x1], 1 }
 0x174   :  { %333 = vsyncpa [#allocation6], 1 }
 0x175   :  { %335 = vsyncpa [#allocation6 + $0x1], 1 }
 0x176   :  { %336 = vsyncpa [#allocation4], 1 }
 0x177   :  { %338 = vsyncpa [#allocation4 + $0x1], 1 }

</bundles_post_ra>
